<compile_context>
chip_gen: v6e
topology: v6e:2x2x1
jax: 0.10.0
libtpu: 0.0.40
codegen_flags: <defaults>
</compile_context>

<pallas_src>
import functools
import math

import jax
import jax.numpy as jnp
from jax.experimental import pallas as pl
from jax.experimental.pallas import tpu as pltpu

_MAX_TILE_ROWS = 1024   # per-grid-step overhead amortization saturates ~512-1024 rows
_LANE = 128


def _layernorm_kernel(x_ref, alpha_ref, beta_ref, o_ref, *, eps, features):
    x = x_ref[...].astype(jnp.float32)                       # (tile_rows, f_pad)
    f_pad = x.shape[-1]
    mean = jnp.sum(x, axis=-1, keepdims=True) * jnp.float32(1.0 / features)
    diff = x - mean
    if f_pad != features:
        # Padded lanes hold (0 - mean); mask them out of the variance sum.
        lane = jax.lax.broadcasted_iota(jnp.int32, (1, f_pad), 1)
        masked = jnp.where(lane < features, diff, 0.0)
    else:
        masked = diff
    # Unbiased variance (ddof=1), matching torch.std(..., unbiased=True)**2.
    var = jnp.sum(masked * masked, axis=-1, keepdims=True) * jnp.float32(
        1.0 / (features - 1))
    inv = jax.lax.rsqrt(var + jnp.float32(eps))               # EUP rsqrt
    # Fused apply; (1, f_pad) params broadcast inside the VPU op (no broadcast_to).
    y = alpha_ref[...].astype(jnp.float32) * (diff * inv) \
        + beta_ref[...].astype(jnp.float32)
    o_ref[...] = y.astype(o_ref.dtype)


def _vmem_budgets():
    """(tile_budget_bytes, scoped_vmem_limit_bytes), generation-dependent."""
    try:
        cap = int(pltpu.get_tpu_info().vmem_capacity_bytes)
    except Exception:
        cap = 64 * 1024 * 1024                 # conservative default (v7x per-TC VMEM)
    # v5e/v6e (128 MiB): 64 MiB budget / 96 MiB limit.  v7x (64 MiB): 32 / 48 MiB.
    tile_budget = min(cap // 2, 64 * 1024 * 1024)
    vmem_limit = min((cap * 3) // 4, 96 * 1024 * 1024)
    return tile_budget, vmem_limit


def _pick_tile_rows(rows, f_pad, itemsize, tile_budget):
    """Row tile: dtype-native sublane multiple, VMEM-budgeted, megacore-aware."""
    sub = max(8, 32 // itemsize)               # sublane packing: 8 f32 / 16 bf16 / 32 int8
    rows_up = pl.cdiv(rows, sub) * sub
    # Per tile row: double-buffered input+output tiles + ~3 full-tile f32 temporaries.
    bytes_per_row = 4 * f_pad * itemsize + 12 * f_pad
    max_rows = tile_budget // max(bytes_per_row, 1)
    max_rows = max(sub, (max_rows // sub) * sub)
    max_rows = min(max_rows, _MAX_TILE_ROWS)
    # Megacore: ensure the "parallel" row axis has >=2 (>=4 for large inputs)
    # grid steps so both v7x TensorCores get a share of HBM bandwidth.
    if rows_up > 2048:
        min_steps = 4
    elif rows_up >= 512:
        min_steps = 2
    else:
        min_steps = 1
    if min_steps > 1:
        cap = pl.cdiv(pl.cdiv(rows_up, min_steps), sub) * sub
        max_rows = min(max_rows, max(cap, sub))
    return min(max_rows, rows_up)


def layer_normalization(x, alpha, beta, eps=1e-6):
    """x: (..., features); alpha, beta: (features,). Matches the PyTorch module."""
    orig_shape = x.shape
    features = orig_shape[-1]
    if features < 2:
        raise ValueError("torch.std is unbiased (ddof=1); features must be >= 2")
    rows = math.prod(orig_shape[:-1])

    x2 = x.reshape(rows, features)
    alpha2 = alpha.reshape(1, features)
    beta2 = beta.reshape(1, features)

    # Lane-dense layout: pad the feature axis to a multiple of 128 so stores are
    # full-lane vst; padded alpha/beta are zero and the kernel masks the variance.
    f_pad = pl.cdiv(features, _LANE) * _LANE
    if f_pad != features:
        pad = f_pad - features
        x2 = jnp.pad(x2, ((0, 0), (0, pad)))
        alpha2 = jnp.pad(alpha2, ((0, 0), (0, pad)))
        beta2 = jnp.pad(beta2, ((0, 0), (0, pad)))

    tile_budget, vmem_limit = _vmem_budgets()
    tile_rows = _pick_tile_rows(rows, f_pad, x2.dtype.itemsize, tile_budget)
    grid = (pl.cdiv(rows, tile_rows),)         # ragged last block padded by Pallas

    kernel = functools.partial(_layernorm_kernel, eps=float(eps), features=features)

    out = pl.pallas_call(
        kernel,
        out_shape=jax.ShapeDtypeStruct((rows, f_pad), x.dtype),
        grid_spec=pltpu.PrefetchScalarGridSpec(
            num_scalar_prefetch=0,
            grid=grid,
            in_specs=[
                pl.BlockSpec((tile_rows, f_pad), lambda i: (i, 0)),
                pl.BlockSpec((1, f_pad), lambda i: (0, 0)),
                pl.BlockSpec((1, f_pad), lambda i: (0, 0)),
            ],
            out_specs=pl.BlockSpec((tile_rows, f_pad), lambda i: (i, 0)),
        ),
        compiler_params=pltpu.CompilerParams(
            dimension_semantics=("parallel",),
            vmem_limit_bytes=int(vmem_limit)),
    )(x2, alpha2, beta2)

    if f_pad != features:
        out = out[:, :features]
    return out.reshape(orig_shape)


def _reference(x, alpha, beta, eps):
    mean = jnp.mean(x, axis=-1, keepdims=True)
    var = jnp.sum((x - mean) ** 2, axis=-1, keepdims=True) / (x.shape[-1] - 1)
    return alpha * (x - mean) / jnp.sqrt(var + eps) + beta


if __name__ == "__main__":
    key = jax.random.PRNGKey(0)
    k1, k2 = jax.random.split(key)

    # Shapes implied by the module: (batch, seq, hidden). hidden=32 exercises
    # the narrow-feature lane-padding/masking path.
    batch, seq, hidden = 2, 8, 32
    x = jax.random.normal(k1, (batch, seq, hidden), dtype=jnp.float32)
    alpha = jnp.ones((hidden,), dtype=jnp.float32)   # nn.Parameter(torch.ones(features))
    beta = jnp.zeros((hidden,), dtype=jnp.float32)   # nn.Parameter(torch.zeros(features))

    y = layer_normalization(x, alpha, beta, eps=1e-6)
    jax.block_until_ready(y)
    assert y.shape == x.shape
    assert jnp.allclose(y, _reference(x, alpha, beta, 1e-6), atol=2e-5, rtol=2e-5), \
        "mismatch vs reference (padded-feature path)"

    # Lane-dense (multiple-of-128) hidden size and a multi-step row grid.
    batch2, seq2, hidden2 = 4, 256, 256
    x2 = jax.random.normal(k2, (batch2, seq2, hidden2), dtype=jnp.float32)
    alpha2 = jnp.ones((hidden2,), dtype=jnp.float32)
    beta2 = jnp.zeros((hidden2,), dtype=jnp.float32)

    y2 = layer_normalization(x2, alpha2, beta2, eps=1e-6)
    jax.block_until_ready(y2)
    assert jnp.allclose(y2, _reference(x2, alpha2, beta2, 1e-6), atol=2e-5, rtol=2e-5), \
        "mismatch vs reference (lane-dense path)"

    print("KERNEL_OK")
</pallas_src>

<mosaic_0001>
module attributes {stable_mosaic.version = 11 : i64} {
  func.func @_layernorm_kernel(%arg0: i32, %arg1: memref<16x128xf32, #tpu.memory_space<vmem>>, %arg2: memref<1x128xf32, #tpu.memory_space<vmem>>, %arg3: memref<1x128xf32, #tpu.memory_space<vmem>>, %arg4: memref<16x128xf32, #tpu.memory_space<vmem>>) attributes {dimension_semantics = [#tpu.dimension_semantics<parallel>], iteration_bounds = array<i64: 1>, scalar_prefetch = 0 : i64, scratch_operands = 0 : i64, tpu.core_type = #tpu.core_type<tc>, window_params = [{transform_indices = @transform_0, window_bounds = array<i64: 16, 128>}, {pipeline_mode = #tpu.pipeline_mode<synchronous>, transform_indices = @transform_1, window_bounds = array<i64: 1, 128>}, {pipeline_mode = #tpu.pipeline_mode<synchronous>, transform_indices = @transform_2, window_bounds = array<i64: 1, 128>}, {transform_indices = @transform_3, window_bounds = array<i64: 16, 128>}]} {
    %c0 = arith.constant 0 : index
    %c0_0 = arith.constant 0 : index
    %0 = vector.load %arg1[%c0, %c0_0] : memref<16x128xf32, #tpu.memory_space<vmem>>, vector<16x128xf32>
    %cst = arith.constant dense<0.000000e+00> : vector<16xf32>
    %1 = vector.multi_reduction <add>, %0, %cst [1] : vector<16x128xf32> to vector<16xf32>
    %2 = vector.shape_cast %1 : vector<16xf32> to vector<16x1xf32>
    %cst_1 = arith.constant 3.125000e-02 : f32
    %3 = vector.broadcast %cst_1 : f32 to vector<16x1xf32>
    %4 = arith.mulf %2, %3 : vector<16x1xf32>
    %5 = vector.broadcast %4 : vector<16x1xf32> to vector<16x128xf32>
    %6 = arith.subf %0, %5 : vector<16x128xf32>
    %7 = tpu.iota {dimensions = array<i32: 1>} : vector<1x128xi32>
    %c32_i32 = arith.constant 32 : i32
    %8 = vector.broadcast %c32_i32 : i32 to vector<1x128xi32>
    %9 = arith.cmpi slt, %7, %8 : vector<1x128xi32>
    %cst_2 = arith.constant 0.000000e+00 : f32
    %10 = vector.shape_cast %9 : vector<1x128xi1> to vector<1x128xi1>
    %11 = vector.broadcast %10 : vector<1x128xi1> to vector<16x128xi1>
    %12 = vector.broadcast %cst_2 : f32 to vector<16x128xf32>
    %13 = arith.select %11, %6, %12 : vector<16x128xi1>, vector<16x128xf32>
    %14 = arith.mulf %13, %13 : vector<16x128xf32>
    %cst_3 = arith.constant dense<0.000000e+00> : vector<16xf32>
    %15 = vector.multi_reduction <add>, %14, %cst_3 [1] : vector<16x128xf32> to vector<16xf32>
    %16 = vector.shape_cast %15 : vector<16xf32> to vector<16x1xf32>
    %cst_4 = arith.constant 0.0322580636 : f32
    %17 = vector.broadcast %cst_4 : f32 to vector<16x1xf32>
    %18 = arith.mulf %16, %17 : vector<16x1xf32>
    %cst_5 = arith.constant 9.99999997E-7 : f32
    %19 = vector.broadcast %cst_5 : f32 to vector<16x1xf32>
    %20 = arith.addf %18, %19 : vector<16x1xf32>
    %21 = math.rsqrt %20 : vector<16x1xf32>
    %c0_6 = arith.constant 0 : index
    %c0_7 = arith.constant 0 : index
    %22 = vector.load %arg2[%c0_6, %c0_7] : memref<1x128xf32, #tpu.memory_space<vmem>>, vector<1x128xf32>
    %23 = vector.broadcast %21 : vector<16x1xf32> to vector<16x128xf32>
    %24 = arith.mulf %6, %23 : vector<16x128xf32>
    %25 = vector.broadcast %22 : vector<1x128xf32> to vector<16x128xf32>
    %26 = arith.mulf %25, %24 : vector<16x128xf32>
    %c0_8 = arith.constant 0 : index
    %c0_9 = arith.constant 0 : index
    %27 = vector.load %arg3[%c0_8, %c0_9] : memref<1x128xf32, #tpu.memory_space<vmem>>, vector<1x128xf32>
    %28 = vector.broadcast %27 : vector<1x128xf32> to vector<16x128xf32>
    %29 = arith.addf %26, %28 : vector<16x128xf32>
    %c0_10 = arith.constant 0 : index
    %c0_11 = arith.constant 0 : index
    %30 = vector.load %arg4[%c0_10, %c0_11] : memref<16x128xf32, #tpu.memory_space<vmem>>, vector<16x128xf32>
    tpu.vector_store %arg4[%c0_10, %c0_11], %29 {strides = array<i32>} : memref<16x128xf32, #tpu.memory_space<vmem>>, vector<16x128xf32>,
    return
  }
  func.func @transform_0(%arg0: i32) -> (i32, i32) {
    %c0_i32 = arith.constant 0 : i32
    %c0_i32_0 = arith.constant 0 : i32
    return %arg0, %c0_i32 : i32, i32
  }
  func.func @transform_1(%arg0: i32) -> (i32, i32) {
    %c0_i32 = arith.constant 0 : i32
    %c0_i32_0 = arith.constant 0 : i32
    %c0_i32_1 = arith.constant 0 : i32
    return %c0_i32, %c0_i32_0 : i32, i32
  }
  func.func @transform_2(%arg0: i32) -> (i32, i32) {
    %c0_i32 = arith.constant 0 : i32
    %c0_i32_0 = arith.constant 0 : i32
    %c0_i32_1 = arith.constant 0 : i32
    return %c0_i32, %c0_i32_0 : i32, i32
  }
  func.func @transform_3(%arg0: i32) -> (i32, i32) {
    %c0_i32 = arith.constant 0 : i32
    %c0_i32_0 = arith.constant 0 : i32
    return %arg0, %c0_i32 : i32, i32
  }
}

</mosaic_0001>

<bundles_post_ra>
// kernel: tpu_custom_call.1
= control target key start
LH: loop header
LB: loop body
LE: loop exit
PB: predicated region body
PF: predicated region fallthrough
CT: control target
= control target key end

     0   :  { %8 = vsyncpa [#allocation3], 0  ;;  %s193_s0 = inlined_call_operand.hbm [shape: f32[16,128], index: 0, kind: input, shape index: {}]   ;;  %s194_s1 = inlined_call_operand.vmem [shape: f32[1,128], index: 1, kind: input, shape index: {}]   ;;  %s195_s2 = inlined_call_operand.vmem [shape: f32[1,128], index: 2, kind: input, shape index: {}]   ;;  %s196_s3 = inlined_call_operand.hbm [shape: f32[16,128], index: 3, kind: output, shape index: {}]  }
   0x1   :  { %9 = vsyncpa [#allocation4], 0  ;;  %s151_s12 = smov [#allocation2]  }
   0x2   :  { %s15_s13 = sshll.u32 %s151_s12, 4  ;;  %s16_s13 = int_to_ptr.vmem [resolvable:$true] %s15_s13 }
   0x3   :  { %s115_s14 = scalar_lea.vmem %s16_s13, 256  ;;  %p120_p1 = scmp.lt.s32.totalorder %s16_s13, %s16_s13 }
   0x4   :  { %p116_p0 = scmp.ne.s32.totalorder %s16_s13, %s115_s14  ;;  %p121_p2 = scmp.lt.s32.totalorder %s115_s14, %s115_s14 }
   0x6   :  { %p122_p3 = por %p121_p2, %p120_p1 }
   0x8   :  { %p123_p4 = pnand %p122_p3, %p116_p0 }
   0xa   :  { %126 = shalt.err (!%p123_p4)
}
   0xb   :  { %s152_s15 = smov 128   ;;  %s153_s16 = smov 8  }
   0xc   :  { %21 = dma.hbm_to_vmem [thread:$0]  %s193_s0, 256, %s16_s13, [#allocation3], %s152_s15, %s152_s15, %s153_s16  }
   0xd   :  { %147 = dma.done.wait [#allocation3], 256  }
   0xe   :  { %148 = vsyncadd [#allocation3], 4294967040  ;;  %v29_v0 = vld [vmem:[#allocation2] sm:$0xff]  ;;  %v30_v1 = vld [vmem:[#allocation2 + $0x8] sm:$0xff]  ;;  %v39_v2 = vlaneseq  ;;  %s154_s22 = smov [#allocation5]  }
   0xf   :  { %31 = vadd.xlane.f32.xlu0 %v29_v0  ;;  %v97_v21 = vld [vmem:[%s194_s1] ss:$0 sm:$0xff]  ;;  %s85_s23 = sshll.u32 %s154_s22, 4  ;;  %s86_s23 = int_to_ptr.vmem [resolvable:$true] %s85_s23 }
  0x10   :  { %v40_v3 = vand.u32 127, %v39_v2  ;;  %v98_v23 = vld [vmem:[%s195_s2] ss:$0 sm:$0xff]  ;;  %s127_s24 = scalar_lea.vmem %s86_s23, 256  ;;  %p132_p6 = scmp.lt.s32.totalorder %s86_s23, %s86_s23 }
  0x11   :  { %p128_p5 = scmp.ne.s32.totalorder %s86_s23, %s127_s24  ;;  %p133_p7 = scmp.lt.s32.totalorder %s127_s24, %s127_s24 }
  0x12   :  { %vm41_vm0 = vcmp.lt.s32.totalorder %v40_v3, 32 }
  0x13   :  { %33 = vadd.xlane.f32.xlu0 %v30_v1  ;;  %p134_p8 = por %p133_p7, %p132_p6 }
  0x15   :  { %p135_p9 = pnand %p134_p8, %p128_p5 }
  0x98   :  { %v32_v4 = vpop.xlane.xlu0 %31 }
  0x99   :  { %v35_v5 = vmul.f32 0.03125, %v32_v4 }
  0x9b   :  { %v37_v6 = vsub.f32 %v29_v0, %v35_v5 }
  0x9c   :  { %v34_v7 = vpop.xlane.xlu0 %33 }
  0x9d   :  { %v36_v8 = vmul.f32 0.03125, %v34_v7  ;;  %v44_v9 = vsel %vm41_vm0, %v37_v6, 0.0 }
  0x9e   :  { %v46_v10 = vmul.f32 %v44_v9, %v44_v9 }
  0x9f   :  { %v38_v11 = vsub.f32 %v30_v1, %v36_v8 }
  0xa0   :  { %48 = vadd.xlane.f32.xlu1 %v46_v10 }
  0xa1   :  { %v45_v12 = vsel %vm41_vm0, %v38_v11, 0.0 }
  0xa2   :  { %v47_v13 = vmul.f32 %v45_v12, %v45_v12 }
  0xa4   :  { %50 = vadd.xlane.f32.xlu1 %v47_v13 }
 0x129   :  { %v49_v14 = vpop.xlane.xlu1 %48 }
 0x12a   :  { %v52_v15 = vmul.f32 0.032258064, %v49_v14 }
 0x12c   :  { %v54_v16 = vadd.f32 1e-06, %v52_v15 }
 0x12d   :  { %v51_v17 = vpop.xlane.xlu1 %50 }
 0x12e   :  { %103 = vrsqrt.f32 %v54_v16  ;;  %v53_v18 = vmul.f32 0.032258064, %v51_v17 }
 0x130   :  { %v55_v19 = vadd.f32 1e-06, %v53_v18 }
 0x132   :  { %105 = vrsqrt.f32 %v55_v19 }
 0x13b   :  { %v104_v20 = vpop.eup %103 }
 0x13c   :  { %v59_v22 = vmul.f32 %v104_v20, %v37_v6 }
 0x13e   :  { %v67_v24 = vmul.f32 %v97_v21, %v59_v22 }
 0x13f   :  { %v106_v25 = vpop.eup %105 }
 0x140   :  { %v60_v26 = vmul.f32 %v106_v25, %v38_v11  ;;  %v76_v27 = vadd.f32 %v98_v23, %v67_v24 }
 0x142   :  { %v68_v28 = vmul.f32 %v97_v21, %v60_v26  ;;  %78 = vst [vmem:[#allocation5] sm:$0xff] %v76_v27 }
 0x144   :  { %v77_v29 = vadd.f32 %v98_v23, %v68_v28 }
 0x146   :  { %79 = vst [vmem:[#allocation5 + $0x8] sm:$0xff] %v77_v29 }
 0x147   :  { %138 = shalt.err (!%p135_p9)
}
 0x148   :  { %91 = dma.vmem_to_hbm [thread:$0]  %s86_s23, 256, %s196_s3, [#allocation4], %s152_s15, %s152_s15, %s153_s16  }
 0x149   :  { %149 = dma.done.wait [#allocation4], 256  }
 0x14a   :  { %150 = vsyncadd [#allocation4], 4294967040 }
 0x14b   :  { %95 = vsyncpa [#allocation3], 1 }
 0x14c   :  { %96 = vsyncpa [#allocation4], 1 }

</bundles_post_ra>
